<compile_context>
chip_gen: v5e
topology: v5e:2x2
jax: 0.10.0
libtpu: 0.0.40
codegen_flags: <defaults>
</compile_context>

<pallas_src>
import functools

import jax
import jax.numpy as jnp
from jax import lax
from jax.experimental import pallas as pl
from jax.experimental.pallas import tpu as pltpu

_LANES = 128
_CHUNK_ROWS = 256          # in-kernel row chunk (multiple of 32 -> clean int8 packing)
_UNROLL_CLASS_LIMIT = 32   # static class unroll below this, lax.fori_loop above


def _round_up(x, m):
    return ((x + m - 1) // m) * m


def _cdiv(a, b):
    return -(-a // b)


def _focal_loss_kernel(f_ref, tgt_ref, out_ref, *, num_classes, chunk_rows, n_chunks):
    """Stream one (tile_r, 128) target tile -> (1, 128) per-lane partial loss sums.

    f_ref:   (num_classes,) f32 per-class loss table, resident in SMEM.
    tgt_ref: (tile_r, 128) int8/int16/int32 class indices; pad slots hold -1.
    out_ref: (1, 128) f32 per-lane partial sums for this tile.
    """

    def chunk_body(j, acc):
        r0 = pl.multiple_of(j * chunk_rows, chunk_rows)
        # Narrow dtype on the HBM stream; widen once in-register for robust compares.
        t = tgt_ref[pl.ds(r0, chunk_rows), :].astype(jnp.int32)
        vals = jnp.zeros((chunk_rows, _LANES), jnp.float32)
        if num_classes <= _UNROLL_CLASS_LIMIT:
            for c in range(num_classes):                       # static unroll, small C
                vals = vals + jnp.where(t == c, f_ref[c], 0.0)
        else:
            # TODO(synk): for very large num_classes (>~64) a one-hot x f MXU
            # contraction would move this O(C) select chain off the VPU.
            def class_body(c, v):
                return v + jnp.where(t == c, f_ref[c], 0.0)
            vals = lax.fori_loop(0, num_classes, class_body, vals)
        # Single sublane reduce per chunk; lanes stay separate until the wrapper.
        return acc + jnp.sum(vals, axis=0, keepdims=True)

    acc = lax.fori_loop(0, n_chunks, chunk_body,
                        jnp.zeros((1, _LANES), jnp.float32))
    out_ref[...] = acc


def _compute_class_table(x, *, gamma, alpha_arr, num_classes):
    """f[c] = -(1 - pt_c)^gamma * alpha_c * lp0_c, lp0_c = log_softmax(flat_row_c)[0].

    Tiny O(C^2) computation done once in plain JAX (hoisted out of the kernel).
    """
    if x.ndim > 2:
        n, c = x.shape[0], x.shape[1]
        x3 = x.reshape(n, c, -1)               # (N, C, HW) -- view, no copy
        hw = x3.shape[2]
        if hw >= c:
            # flat[r, k] = x3[0, k, r] for r < C  ->  slab = x3[0, :, :C].T  (C, C)
            slab = jnp.transpose(x3[0, :, :c])
        else:
            # rare HW < C case: rows 0..C-1 span batches
            slab = jnp.transpose(x3, (0, 2, 1)).reshape(-1, c)[:c]
    else:
        c = x.shape[1]
        slab = x[:min(c, x.shape[0]), :]
    slab = slab.astype(jnp.float32)
    n_rows = int(slab.shape[0])

    lp = jax.nn.log_softmax(slab, axis=1)
    lp0 = lp[:, 0]                             # (n_rows,)
    pt = jnp.exp(lp0)

    logpt = lp0
    if alpha_arr is not None:
        a = jnp.ones((n_rows,), jnp.float32)
        take = min(int(alpha_arr.shape[0]), n_rows)
        a = a.at[:take].set(alpha_arr[:take])
        logpt = logpt * a

    g = float(gamma)
    if g == 0.0:
        pow_term = jnp.ones_like(pt)
    elif g.is_integer() and 0.0 < g <= 8.0:
        omp = 1.0 - pt
        pow_term = omp
        for _ in range(int(g) - 1):
            pow_term = pow_term * omp
    else:
        pow_term = jnp.power(1.0 - pt, g)

    f = -1.0 * pow_term * logpt                # (n_rows,)
    if n_rows < num_classes:
        # Flat matrix has fewer rows than classes; such targets would already be
        # an OOB gather in PyTorch -- assumed absent (they contribute 0 here).
        f = jnp.concatenate([f, jnp.zeros((num_classes - n_rows,), jnp.float32)])
    return f


def focal_loss(logits, target, *, gamma=0, alpha=None, size_average=True,
               tile_rows=65536):
    """Matches FocalLoss(gamma, alpha, size_average).forward(logits, target)."""
    x = jnp.asarray(logits)
    if x.ndim < 2:
        raise ValueError("logits must have rank >= 2")
    num_classes = int(x.shape[1])

    # ---- alpha handling mirrors the module's __init__ ----
    if isinstance(alpha, bool):
        raise ValueError("alpha must be float/int/list/None")
    if isinstance(alpha, (float, int)):
        alpha_arr = jnp.array([float(alpha), 1.0 - float(alpha)], jnp.float32)
    elif isinstance(alpha, (list, tuple)):
        alpha_arr = jnp.array(alpha, dtype=jnp.float32)
    elif alpha is None:
        alpha_arr = None
    else:
        alpha_arr = jnp.asarray(alpha, dtype=jnp.float32).reshape(-1)

    # ---- per-class loss table, computed once outside the grid loop ----
    f_table = _compute_class_table(x, gamma=gamma, alpha_arr=alpha_arr,
                                   num_classes=num_classes)

    # ---- targets: lane-dense (rows, 128) stream in the narrowest safe dtype ----
    tgt_flat = jnp.asarray(target).reshape(-1)
    n_valid = int(tgt_flat.shape[0])
    if num_classes <= 127:
        tgt_dtype = jnp.int8
    elif num_classes <= 32767:
        tgt_dtype = jnp.int16
    else:
        tgt_dtype = jnp.int32

    r_total = max(_cdiv(n_valid, _LANES), 1)
    r8 = _round_up(r_total, 8)
    tile_rows = max(int(tile_rows), _CHUNK_ROWS)
    if r8 <= _CHUNK_ROWS:
        n_tiles, tile_r = 1, r8
        chunk_rows, n_chunks = r8, 1
    else:
        n_tiles = _cdiv(r8, tile_rows)
        tile_r = _round_up(_cdiv(r8, n_tiles), _CHUNK_ROWS)   # minimal over-pad
        chunk_rows, n_chunks = _CHUNK_ROWS, tile_r // _CHUNK_ROWS
    r_pad = n_tiles * tile_r

    # Pad value -1 matches no class -> contributes 0; cast + pad fuse in XLA.
    tgt2d = jnp.pad(tgt_flat.astype(tgt_dtype),
                    (0, r_pad * _LANES - n_valid),
                    constant_values=-1).reshape(r_pad, _LANES)

    kernel = functools.partial(_focal_loss_kernel, num_classes=num_classes,
                               chunk_rows=chunk_rows, n_chunks=n_chunks)

    partials = pl.pallas_call(
        kernel,
        out_shape=jax.ShapeDtypeStruct((n_tiles, _LANES), jnp.float32),
        grid_spec=pltpu.PrefetchScalarGridSpec(
            num_scalar_prefetch=0,
            grid=(n_tiles,),
            in_specs=[
                pl.BlockSpec(memory_space=pltpu.MemorySpace.SMEM),  # f[c] table
                pl.BlockSpec((tile_r, _LANES), lambda i: (i, 0)),   # target stream
            ],
            out_specs=pl.BlockSpec((1, _LANES), lambda i: (i, 0)),  # per-tile partials
        ),
        compiler_params=pltpu.CompilerParams(
            dimension_semantics=("parallel",),      # independent tiles -> both TCs on v7x
            vmem_limit_bytes=32 * 1024 * 1024),
    )(f_table, tgt2d)

    total = jnp.sum(partials)                       # tiny XLA reduce over n_tiles*128
    if size_average:
        return total / n_valid
    return total


def _focal_loss_ref(logits, target, *, gamma, alpha, size_average):
    """Pure-JAX reference reproducing the PyTorch semantics exactly."""
    n, c = logits.shape[0], logits.shape[1]
    x = jnp.transpose(logits.reshape(n, c, -1), (0, 2, 1)).reshape(-1, c)
    t = target.reshape(-1)
    lp = jax.nn.log_softmax(x, axis=1)
    logpt = lp[t, 0]                       # gather(dim=0, target) quirk
    pt = jnp.exp(logpt)
    if alpha is not None:
        logpt = logpt * alpha[t]
    loss = -1.0 * (1.0 - pt) ** gamma * logpt
    return jnp.mean(loss) if size_average else jnp.sum(loss)


if __name__ == "__main__":
    key = jax.random.PRNGKey(0)
    k_x, k_t = jax.random.split(key)

    N, C, H, W = 2, 4, 16, 16
    x = jax.random.normal(k_x, (N, C, H, W), dtype=jnp.float32)
    target = jax.random.randint(k_t, (N, H, W), 0, C, dtype=jnp.int32)

    gamma = 2.0
    alpha = [0.1, 0.2, 0.3, 0.4]           # list path in __init__ (len == C)

    out = focal_loss(x, target, gamma=gamma, alpha=alpha, size_average=True)
    out = jax.block_until_ready(out)

    ref = _focal_loss_ref(x, target, gamma=gamma,
                          alpha=jnp.array(alpha, jnp.float32),
                          size_average=True)
    assert jnp.allclose(out, ref, atol=1e-5, rtol=1e-5), (out, ref)
    print("KERNEL_OK")
</pallas_src>

<mosaic_0001>
module attributes {stable_mosaic.version = 11 : i64} {
  func.func @_focal_loss_kernel(%arg0: i32, %arg1: memref<4xf32, #tpu.memory_space<smem>>, %arg2: memref<8x128xi8, #tpu.memory_space<vmem>>, %arg3: memref<1x128xf32, #tpu.memory_space<vmem>>) attributes {dimension_semantics = [#tpu.dimension_semantics<parallel>], iteration_bounds = array<i64: 1>, scalar_prefetch = 0 : i64, scratch_operands = 0 : i64, tpu.core_type = #tpu.core_type<tc>, window_params = [{transform_indices = @transform_0, window_bounds = array<i64: 4>}, {transform_indices = @transform_1, window_bounds = array<i64: 8, 128>}, {transform_indices = @transform_2, window_bounds = array<i64: 1, 128>}]} {
    %cst = arith.constant 0.000000e+00 : f32
    %0 = vector.broadcast %cst : f32 to vector<1x128xf32>
    %c0_i32 = arith.constant 0 : i32
    %c8_i32 = arith.constant 8 : i32
    %1 = arith.muli %c0_i32, %c8_i32 : i32
    %2 = tpu.assume_multiple %1, 8 : i32
    %3 = arith.index_cast %2 : i32 to index
    %c0 = arith.constant 0 : index
    %4 = vector.load %arg2[%3, %c0] : memref<8x128xi8, #tpu.memory_space<vmem>>, vector<8x128xi8>
    %5 = arith.extsi %4 : vector<8x128xi8> to vector<8x128xi32>
    %cst_0 = arith.constant 0.000000e+00 : f32
    %6 = vector.broadcast %cst_0 : f32 to vector<8x128xf32>
    %c0_i32_1 = arith.constant 0 : i32
    %7 = vector.broadcast %c0_i32_1 : i32 to vector<8x128xi32>
    %8 = arith.cmpi eq, %5, %7 : vector<8x128xi32>
    %c0_2 = arith.constant 0 : index
    %9 = memref.load %arg1[%c0_2] : memref<4xf32, #tpu.memory_space<smem>>
    %cst_3 = arith.constant 0.000000e+00 : f32
    %10 = vector.broadcast %9 : f32 to vector<8x128xf32>
    %11 = vector.broadcast %cst_3 : f32 to vector<8x128xf32>
    %12 = arith.select %8, %10, %11 : vector<8x128xi1>, vector<8x128xf32>
    %13 = arith.addf %6, %12 : vector<8x128xf32>
    %c1_i32 = arith.constant 1 : i32
    %14 = vector.broadcast %c1_i32 : i32 to vector<8x128xi32>
    %15 = arith.cmpi eq, %5, %14 : vector<8x128xi32>
    %c1 = arith.constant 1 : index
    %16 = memref.load %arg1[%c1] : memref<4xf32, #tpu.memory_space<smem>>
    %cst_4 = arith.constant 0.000000e+00 : f32
    %17 = vector.broadcast %16 : f32 to vector<8x128xf32>
    %18 = vector.broadcast %cst_4 : f32 to vector<8x128xf32>
    %19 = arith.select %15, %17, %18 : vector<8x128xi1>, vector<8x128xf32>
    %20 = arith.addf %13, %19 : vector<8x128xf32>
    %c2_i32 = arith.constant 2 : i32
    %21 = vector.broadcast %c2_i32 : i32 to vector<8x128xi32>
    %22 = arith.cmpi eq, %5, %21 : vector<8x128xi32>
    %c2 = arith.constant 2 : index
    %23 = memref.load %arg1[%c2] : memref<4xf32, #tpu.memory_space<smem>>
    %cst_5 = arith.constant 0.000000e+00 : f32
    %24 = vector.broadcast %23 : f32 to vector<8x128xf32>
    %25 = vector.broadcast %cst_5 : f32 to vector<8x128xf32>
    %26 = arith.select %22, %24, %25 : vector<8x128xi1>, vector<8x128xf32>
    %27 = arith.addf %20, %26 : vector<8x128xf32>
    %c3_i32 = arith.constant 3 : i32
    %28 = vector.broadcast %c3_i32 : i32 to vector<8x128xi32>
    %29 = arith.cmpi eq, %5, %28 : vector<8x128xi32>
    %c3 = arith.constant 3 : index
    %30 = memref.load %arg1[%c3] : memref<4xf32, #tpu.memory_space<smem>>
    %cst_6 = arith.constant 0.000000e+00 : f32
    %31 = vector.broadcast %30 : f32 to vector<8x128xf32>
    %32 = vector.broadcast %cst_6 : f32 to vector<8x128xf32>
    %33 = arith.select %29, %31, %32 : vector<8x128xi1>, vector<8x128xf32>
    %34 = arith.addf %27, %33 : vector<8x128xf32>
    %cst_7 = arith.constant dense<0.000000e+00> : vector<128xf32>
    %35 = vector.multi_reduction <add>, %34, %cst_7 [0] : vector<8x128xf32> to vector<128xf32>
    %36 = vector.shape_cast %35 : vector<128xf32> to vector<1x128xf32>
    %37 = arith.addf %0, %36 : vector<1x128xf32>
    %c1_i32_8 = arith.constant 1 : i32
    %c0_9 = arith.constant 0 : index
    %c0_10 = arith.constant 0 : index
    %38 = vector.load %arg3[%c0_9, %c0_10] : memref<1x128xf32, #tpu.memory_space<vmem>>, vector<1x128xf32>
    tpu.vector_store %arg3[%c0_9, %c0_10], %37 {strides = array<i32>} : memref<1x128xf32, #tpu.memory_space<vmem>>, vector<1x128xf32>,
    return
  }
  func.func @transform_0(%arg0: i32) -> i32 {
    %c0_i32 = arith.constant 0 : i32
    %c0_i32_0 = arith.constant 0 : i32
    return %c0_i32 : i32
  }
  func.func @transform_1(%arg0: i32) -> (i32, i32) {
    %c0_i32 = arith.constant 0 : i32
    %c0_i32_0 = arith.constant 0 : i32
    return %arg0, %c0_i32 : i32, i32
  }
  func.func @transform_2(%arg0: i32) -> (i32, i32) {
    %c0_i32 = arith.constant 0 : i32
    %c0_i32_0 = arith.constant 0 : i32
    return %arg0, %c0_i32 : i32, i32
  }
}

</mosaic_0001>

<bundles_post_ra>
// kernel: tpu_custom_call.1
= control target key start
LH: loop header
LB: loop body
LE: loop exit
PB: predicated region body
PF: predicated region fallthrough
CT: control target
= control target key end

     0   :  { %7 = vsyncpa [#allocation5], 0  ;;  %s186_s0 = inlined_call_operand.hbm [shape: f32[4], index: 0, kind: input, shape index: {}]   ;;  %s187_s1 = inlined_call_operand.hbm [shape: s8[8,128], index: 1, kind: input, shape index: {}]   ;;  %s188_s2 = inlined_call_operand.hbm [shape: f32[1,128], index: 2, kind: output, shape index: {}]  }
   0x1   :  { %8 = vsyncpa [#allocation3], 0 }
   0x2   :  { %9 = vsyncpa [#allocation4], 0  ;;  %s15_s11 = sshll.u32 %s186_s0, 4  ;;  %s24_s14 = sshll.u32 %s187_s1, 4  ;;  %s16_s11 = int_to_ptr.hbm [resolvable:$true] %s15_s11  ;;  %s25_s14 = int_to_ptr.hbm [resolvable:$true] %s24_s14 }
   0x3   :  { %s159_s15 = smov [#allocation2]   ;;  %s160_s16 = smov [#allocation6]  }
   0x4   :  { %18 = dma.hbm_to_smem %s16_s11, 16, %s159_s15, [#allocation5]  }
   0x5   :  { %s26_s17 = sshll.u32 %s160_s16, 4  ;;  %s27_s17 = int_to_ptr.vmem [resolvable:$true] %s26_s17 }
   0x6   :  { %29 = dma.hbm_to_vmem [thread:$0]  %s25_s14, 32, %s27_s17, [#allocation3]  }
   0x7   :  { %153 = dma.done.wait [#allocation5], 16  }
   0x8   :  { %154 = vsyncadd [#allocation5], 4294967280 }
   0x9   :  { %155 = dma.done.wait [#allocation3], 32  }
   0xa   :  { %156 = vsyncadd [#allocation3], 4294967264 }
   0xb   :  { %38 = sfence }
   0xc   :  { %v39_v0 = vld [vmem:[#allocation6] sm:$0x3]  ;;  %s42_s18 = sld [smem:[#allocation2]]  ;;  %s161_s1 = smov [#allocation7]  }
   0xd   :  { %v40_v1 = vunpack.c.0.s8 %v39_v0  ;;  %s87_s0 = sld [smem:[#allocation2 + $0x1]]  ;;  %s74_s21 = sshll.u32 %s161_s1, 4  ;;  %s75_s21 = int_to_ptr.vmem [resolvable:$true] %s74_s21 }
   0xe   :  { %s88_s19 = sld [smem:[#allocation2 + $0x2]]  ;;  %s76_s24 = sshll.u32 %s188_s2, 4  ;;  %s77_s24 = int_to_ptr.hbm [resolvable:$true] %s76_s24 }
   0xf   :  { %s89_s20 = sld [smem:[#allocation2 + $0x3]]  ;;  %vm41_vm0 = vcmp.eq.s32.totalorder %v40_v1, 0  ;;  %vm46_vm1 = vcmp.eq.s32.totalorder %v40_v1, 1  ;;  %vm51_vm2 = vcmp.eq.s32.totalorder %v40_v1, 2  ;;  %vm56_vm3 = vcmp.eq.s32.totalorder %v40_v1, 3 }
  0x12   :  { %v43_v2 = vstv %s42_s18 }
  0x13   :  { %v44_v3 = vsel %vm41_vm0, %v43_v2, 0.0  ;;  %v48_v4 = vstv %s87_s0 }
  0x14   :  { %v49_v5 = vsel %vm46_vm1, %v48_v4, 0.0  ;;  %v53_v6 = vstv %s88_s19 }
  0x15   :  { %v50_v7 = vadd.f32 %v49_v5, %v44_v3  ;;  %v54_v8 = vsel %vm51_vm2, %v53_v6, 0.0  ;;  %v58_v9 = vstv %s89_s20 }
  0x16   :  { %v59_v10 = vsel %vm56_vm3, %v58_v9, 0.0 }
  0x17   :  { %v55_v11 = vadd.f32 %v54_v8, %v50_v7 }
  0x19   :  { %v60_v12 = vadd.f32 %v59_v10, %v55_v11 }
  0x1b   :  { %v61_v13 = vrot.slane %v60_v12, 4 }
  0x1d   :  { %v62_v14 = vadd.f32 %v61_v13, %v60_v12 }
  0x1f   :  { %v63_v15 = vrot.slane %v62_v14, 2 }
  0x21   :  { %v64_v16 = vadd.f32 %v63_v15, %v62_v14 }
  0x23   :  { %v65_v17 = vrot.slane %v64_v16, 1 }
  0x25   :  { %v66_v18 = vadd.f32 %v65_v17, %v64_v16 }
  0x27   :  { %68 = vst [vmem:[#allocation7] sm:$0x1] %v66_v18 }
  0x28   :  { %79 = dma.vmem_to_hbm [thread:$0]  %s75_s21, 16, %s77_s24, [#allocation4]  }
  0x29   :  { %157 = dma.done.wait [#allocation4], 16  }
  0x2a   :  { %158 = vsyncadd [#allocation4], 4294967280 }
  0x2b   :  { %84 = vsyncpa [#allocation3], 1 }
  0x2c   :  { %85 = vsyncpa [#allocation4], 1 }
  0x2d   :  { %86 = vsyncpa [#allocation5], 1 }

</bundles_post_ra>
